<compile_context>
chip_gen: v6e
topology: v6e:2x2x1
jax: 0.10.0
libtpu: 0.0.40
codegen_flags: <defaults>
</compile_context>

<pallas_src>
import functools

import jax
import jax.numpy as jnp
from jax.experimental import pallas as pl
from jax.experimental.pallas import tpu as pltpu


# --------------------------- tiling helpers ----------------------------------

_FUSED_VMEM_BUDGET = 48 * 1024 * 1024   # conservative (v7x: 64 MiB VMEM / TC)
_FUSED_TC = 128                          # lane-dense, maximizes fused N ceiling
_FUSED_VMEM_LIMIT = 56 << 20             # < 64 MiB physical on v7x
_TWO_PASS_VMEM_LIMIT = 32 << 20


def _sublane_multiple(dtype):
    return {4: 8, 2: 16, 1: 32}[jnp.dtype(dtype).itemsize]


def _pick_tiles(n, c, dtype, *, max_tn, max_tc):
    """Row / feature tile sizes.

    TN is a multiple of the dtype sublane packing unless it equals full N;
    TC is a multiple of 128 unless it equals full C.
    """
    sub = _sublane_multiple(dtype)
    assert max_tn % sub == 0, f"max_tn={max_tn} must be a multiple of {sub}"
    assert max_tc % 128 == 0, f"max_tc={max_tc} must be a multiple of 128"
    tn = n if n <= max_tn else max_tn
    tc = c if c <= max_tc else max_tc
    return tn, tc


def _fused_slab_fits(n, tc, dtype, budget):
    """Conservative VMEM footprint check for the fused training kernel.

    Double-buffered x slab + double-buffered y slab + ~3 f32 slabs of live
    compute intermediates (x cast, centered, product).
    """
    isz = jnp.dtype(dtype).itemsize
    need = 2 * n * tc * isz + 2 * n * tc * isz + 3 * n * tc * 4
    return need <= budget


def _pad_features(a, c_pad):
    c = a.shape[-1]
    if c == c_pad:
        return a
    return jnp.pad(a, ((0, 0), (0, c_pad - c)))


# ------------------------------- kernels --------------------------------------


def _bn_fused_train_kernel(x_ref, gamma_ref, beta_ref,
                           y_ref, mean_ref, var_ref, *, eps, n_rows):
    """Fused training BN over one full-N feature slab (N, TC).

    x is read from HBM once; mean / biased-var are computed with the
    numerically stable centered formulation (slab is VMEM-resident so the
    second traversal is cheap), then y is written from the same slab.
    """
    x = x_ref[...].astype(jnp.float32)                       # (N, TC)
    inv_n = 1.0 / n_rows
    mean = jnp.sum(x, axis=0, keepdims=True) * inv_n          # (1, TC)
    centered = x - mean
    var = jnp.sum(centered * centered, axis=0, keepdims=True) * inv_n
    scale = gamma_ref[...] * jax.lax.rsqrt(var + eps)         # EUP
    y_ref[...] = (centered * scale + beta_ref[...]).astype(y_ref.dtype)
    mean_ref[...] = mean
    var_ref[...] = var


def _bn_stats_kernel(x_ref, mean_ref, var_ref, *, n_rows, tn, ragged):
    """Two-pass fallback, pass 1: accumulate per-feature sum / sumsq.

    Grid is (C_tiles, N_tiles) with N (reduction) last / "arbitrary";
    mean_ref / var_ref are (1, TC) blocks resident across the N sweep and
    hold sum / sumsq until the final step converts them in place.
    Row masking only runs on the ragged last N tile (fast path is mask-free).
    """
    i = pl.program_id(1)                                      # N axis (last)

    @pl.when(i == 0)
    def _():
        mean_ref[...] = jnp.zeros_like(mean_ref)
        var_ref[...] = jnp.zeros_like(var_ref)

    x = x_ref[...].astype(jnp.float32)                        # (TN, TC)

    def accum(xv):
        mean_ref[...] += jnp.sum(xv, axis=0, keepdims=True)   # running sum
        var_ref[...] += jnp.sum(xv * xv, axis=0, keepdims=True)  # running sumsq

    if not ragged:
        accum(x)
    else:
        last = pl.num_programs(1) - 1

        @pl.when(i != last)
        def _():
            accum(x)

        @pl.when(i == last)
        def _():
            row = jax.lax.broadcasted_iota(jnp.int32, x.shape, 0) + i * tn
            accum(jnp.where(row < n_rows, x, 0.0))

    @pl.when(i == pl.num_programs(1) - 1)
    def _():
        # TODO(synk): sumsq/N - mean^2 can cancel for |mean| >> std; the fused
        # path uses the centered formulation, this fallback keeps single-pass.
        inv_n = 1.0 / n_rows
        mean = mean_ref[...] * inv_n
        var = jnp.maximum(var_ref[...] * inv_n - mean * mean, 0.0)
        mean_ref[...] = mean
        var_ref[...] = var


def _bn_norm_kernel(x_ref, scale_ref, bias_ref, o_ref):
    """y = x * scale + bias (scale/bias pre-folded per feature; one FMA/elem)."""
    x = x_ref[...].astype(jnp.float32)
    o_ref[...] = (x * scale_ref[...] + bias_ref[...]).astype(o_ref.dtype)


# ------------------------------- wrappers --------------------------------------


def bn_fused_train_call(x, gamma, beta, eps, *, tc=_FUSED_TC,
                        vmem_limit=_FUSED_VMEM_LIMIT):
    """Fused training forward: returns (y, batch_mean, batch_var_biased)."""
    n, c = x.shape                                            # c multiple of 128
    tc = min(tc, c)
    grid = (pl.cdiv(c, tc),)
    slab_spec = pl.BlockSpec((n, tc), lambda j: (0, j))
    vec_spec = pl.BlockSpec((1, tc), lambda j: (0, j))
    y, mean, var = pl.pallas_call(
        functools.partial(_bn_fused_train_kernel, eps=eps, n_rows=n),
        grid=grid,
        out_shape=(
            jax.ShapeDtypeStruct((n, c), x.dtype),
            jax.ShapeDtypeStruct((1, c), jnp.float32),
            jax.ShapeDtypeStruct((1, c), jnp.float32),
        ),
        in_specs=[slab_spec, vec_spec, vec_spec],
        out_specs=(slab_spec, vec_spec, vec_spec),
        compiler_params=pltpu.CompilerParams(
            dimension_semantics=("parallel",),
            vmem_limit_bytes=vmem_limit,
        ),
        cost_estimate=pl.CostEstimate(
            flops=7 * n * c,
            transcendentals=c,
            bytes_accessed=2 * n * c * x.dtype.itemsize + 16 * c,
        ),
    )(x, gamma, beta)
    return y, mean, var


def bn_stats_call(x, *, max_tn=2048, max_tc=512, vmem_limit=_TWO_PASS_VMEM_LIMIT):
    """Per-feature batch mean and biased variance, each shaped (1, C) f32."""
    n, c = x.shape
    tn, tc = _pick_tiles(n, c, x.dtype, max_tn=max_tn, max_tc=max_tc)
    ragged = (n % tn) != 0
    grid = (pl.cdiv(c, tc), pl.cdiv(n, tn))                   # reduction (N) last
    vec_spec = pl.BlockSpec((1, tc), lambda j, i: (0, j))
    mean, var = pl.pallas_call(
        functools.partial(_bn_stats_kernel, n_rows=n, tn=tn, ragged=ragged),
        grid=grid,
        out_shape=(
            jax.ShapeDtypeStruct((1, c), jnp.float32),
            jax.ShapeDtypeStruct((1, c), jnp.float32),
        ),
        in_specs=[pl.BlockSpec((tn, tc), lambda j, i: (i, j))],
        out_specs=(vec_spec, vec_spec),
        compiler_params=pltpu.CompilerParams(
            dimension_semantics=("parallel", "arbitrary"),
            vmem_limit_bytes=vmem_limit,
        ),
        cost_estimate=pl.CostEstimate(
            flops=3 * n * c,
            transcendentals=0,
            bytes_accessed=n * c * x.dtype.itemsize + 8 * c,
        ),
    )(x)
    return mean, var


def bn_norm_call(x, scale, bias, *, max_tn=1024, max_tc=512,
                 vmem_limit=_TWO_PASS_VMEM_LIMIT):
    """y = x * scale + bias, tiled/pipelined; scale/bias are (1, C) f32."""
    n, c = x.shape
    tn, tc = _pick_tiles(n, c, x.dtype, max_tn=max_tn, max_tc=max_tc)
    # C outer / N inner: the per-feature vectors keep a constant block index
    # across the inner N sweep, so they are DMA'd once per C tile.
    grid = (pl.cdiv(c, tc), pl.cdiv(n, tn))
    vec_spec = pl.BlockSpec((1, tc), lambda j, i: (0, j))
    return pl.pallas_call(
        _bn_norm_kernel,
        grid=grid,
        out_shape=jax.ShapeDtypeStruct((n, c), x.dtype),
        in_specs=[pl.BlockSpec((tn, tc), lambda j, i: (i, j)), vec_spec, vec_spec],
        out_specs=pl.BlockSpec((tn, tc), lambda j, i: (i, j)),
        compiler_params=pltpu.CompilerParams(
            dimension_semantics=("parallel", "parallel"),
            vmem_limit_bytes=vmem_limit,
        ),
        cost_estimate=pl.CostEstimate(
            flops=2 * n * c,
            transcendentals=0,
            bytes_accessed=2 * n * c * x.dtype.itemsize + 8 * c,
        ),
    )(x, scale, bias)


# ------------------------------- module ----------------------------------------


class BNWapper:
    """Functional JAX/Pallas port of BNWapper(BatchNorm1d(num_features)).

    forward(input, batch_size=None) ignores batch_size (exactly as the
    PyTorch module does) and applies BatchNorm1d to the (N, C) input.
    """

    def __init__(self, num_features, eps=1e-5, momentum=0.1,
                 fused_vmem_budget=_FUSED_VMEM_BUDGET,
                 stats_max_tn=2048, norm_max_tn=1024, max_tc=512):
        self.num_features = num_features
        self.eps = float(eps)
        self.momentum = float(momentum)
        self.fused_vmem_budget = fused_vmem_budget
        self.stats_max_tn = stats_max_tn
        self.norm_max_tn = norm_max_tn
        self.max_tc = max_tc
        # nn.BatchNorm1d default init.
        self.gamma = jnp.ones((1, num_features), jnp.float32)
        self.beta = jnp.zeros((1, num_features), jnp.float32)
        self.running_mean = jnp.zeros((1, num_features), jnp.float32)
        self.running_var = jnp.ones((1, num_features), jnp.float32)

    # -- helpers ----------------------------------------------------------------

    def _fold(self, mean, var):
        """Tiny (1, C) op: fold (gamma, beta, mean, var) into (scale, bias)."""
        inv = jax.lax.rsqrt(var + self.eps)
        scale = self.gamma * inv
        bias = self.beta - mean * scale
        return scale, bias

    def _update_running(self, batch_mean, batch_var_biased, n):
        # PyTorch uses the unbiased variance for the running update.
        # TODO(synk): for n == 1 PyTorch yields NaN unbiased var; we guard
        # with max(n-1, 1) instead.
        unbiased = batch_var_biased * (n / max(n - 1, 1))
        m = self.momentum
        self.running_mean = (1.0 - m) * self.running_mean + m * batch_mean
        self.running_var = (1.0 - m) * self.running_var + m * unbiased

    # -- forward ----------------------------------------------------------------

    def __call__(self, x, batch_size=None, training=True):
        del batch_size  # BNWapper.forward ignores it (no split/concat needed).
        n, c = x.shape
        c_pad = ((c + 127) // 128) * 128          # lane-dense feature dim
        x_p = _pad_features(x, c_pad)

        if training:
            if _fused_slab_fits(n, min(_FUSED_TC, c_pad), x.dtype,
                                self.fused_vmem_budget):
                # Fused path: one HBM read of x + one HBM write of y.
                g_p = _pad_features(self.gamma, c_pad)
                b_p = _pad_features(self.beta, c_pad)
                y_p, mean_p, var_p = bn_fused_train_call(x_p, g_p, b_p, self.eps)
                mean, var = mean_p[:, :c], var_p[:, :c]
            else:
                # Two-pass fallback for very large N.
                mean_p, var_p = bn_stats_call(
                    x_p, max_tn=self.stats_max_tn, max_tc=self.max_tc)
                mean, var = mean_p[:, :c], var_p[:, :c]
                scale, bias = self._fold(mean, var)
                y_p = bn_norm_call(
                    x_p, _pad_features(scale, c_pad), _pad_features(bias, c_pad),
                    max_tn=self.norm_max_tn, max_tc=self.max_tc)
            self._update_running(mean, var, n)
            return y_p if c_pad == c else y_p[:, :c]

        # Eval path: running statistics.
        scale, bias = self._fold(self.running_mean, self.running_var)
        y_p = bn_norm_call(
            x_p, _pad_features(scale, c_pad), _pad_features(bias, c_pad),
            max_tn=self.norm_max_tn, max_tc=self.max_tc)
        return y_p if c_pad == c else y_p[:, :c]


# --------------------------------- main -----------------------------------------


if __name__ == "__main__":
    key = jax.random.PRNGKey(0)

    # ---- case 1: fused training path (lane-dense C), then eval path ----
    N, C = 200, 256
    x = jax.random.normal(key, (N, C), dtype=jnp.float32)
    mod = BNWapper(C)

    out_train = jax.block_until_ready(mod(x, batch_size=None, training=True))
    mean_ref = jnp.mean(x, axis=0, keepdims=True)
    var_ref = jnp.mean((x - mean_ref) ** 2, axis=0, keepdims=True)
    ref_train = ((x - mean_ref) * jax.lax.rsqrt(var_ref + mod.eps)
                 * mod.gamma + mod.beta)
    assert jnp.allclose(out_train, ref_train, atol=1e-4, rtol=1e-4), "fused train mismatch"

    ref_rm = 0.9 * 0.0 + 0.1 * mean_ref
    ref_rv = 0.9 * 1.0 + 0.1 * var_ref * (N / (N - 1))
    assert jnp.allclose(mod.running_mean, ref_rm, atol=1e-5, rtol=1e-5), "rm mismatch"
    assert jnp.allclose(mod.running_var, ref_rv, atol=1e-4, rtol=1e-4), "rv mismatch"

    out_eval = jax.block_until_ready(mod(x, training=False))
    ref_eval = ((x - mod.running_mean) * jax.lax.rsqrt(mod.running_var + mod.eps)
                * mod.gamma + mod.beta)
    assert jnp.allclose(out_eval, ref_eval, atol=1e-4, rtol=1e-4), "eval mismatch"

    # ---- case 2: two-pass fallback (budget forced to 0), ragged row tiles ----
    mod2 = BNWapper(C, fused_vmem_budget=0,
                    stats_max_tn=128, norm_max_tn=128, max_tc=128)
    out2 = jax.block_until_ready(mod2(x, training=True))
    assert jnp.allclose(out2, ref_train, atol=1e-3, rtol=1e-3), "two-pass mismatch"

    # ---- case 3: C not a multiple of 128 exercises the feature-padding path ----
    N3, C3 = 64, 96
    x3 = jax.random.normal(jax.random.PRNGKey(1), (N3, C3), dtype=jnp.float32)
    mod3 = BNWapper(C3)
    out3 = jax.block_until_ready(mod3(x3, training=True))
    m3 = jnp.mean(x3, axis=0, keepdims=True)
    v3 = jnp.mean((x3 - m3) ** 2, axis=0, keepdims=True)
    ref3 = (x3 - m3) * jax.lax.rsqrt(v3 + mod3.eps) * mod3.gamma + mod3.beta
    assert jnp.allclose(out3, ref3, atol=1e-4, rtol=1e-4), "padded-C mismatch"

    print("KERNEL_OK")
</pallas_src>

<mosaic_0001>
module attributes {stable_mosaic.version = 11 : i64} {
  func.func @_bn_fused_train_kernel(%arg0: i32, %arg1: memref<200x128xf32, #tpu.memory_space<vmem>>, %arg2: memref<1x128xf32, #tpu.memory_space<vmem>>, %arg3: memref<1x128xf32, #tpu.memory_space<vmem>>, %arg4: memref<200x128xf32, #tpu.memory_space<vmem>>, %arg5: memref<1x128xf32, #tpu.memory_space<vmem>>, %arg6: memref<1x128xf32, #tpu.memory_space<vmem>>) attributes {dimension_semantics = [#tpu.dimension_semantics<parallel>], iteration_bounds = array<i64: 2>, scalar_prefetch = 0 : i64, scratch_operands = 0 : i64, tpu.core_type = #tpu.core_type<tc>, window_params = [{transform_indices = @transform_0, window_bounds = array<i64: 200, 128>}, {transform_indices = @transform_1, window_bounds = array<i64: 1, 128>}, {transform_indices = @transform_2, window_bounds = array<i64: 1, 128>}, {transform_indices = @transform_3, window_bounds = array<i64: 200, 128>}, {transform_indices = @transform_4, window_bounds = array<i64: 1, 128>}, {transform_indices = @transform_5, window_bounds = array<i64: 1, 128>}]} {
    %c0 = arith.constant 0 : index
    %c0_0 = arith.constant 0 : index
    %0 = vector.load %arg1[%c0, %c0_0] : memref<200x128xf32, #tpu.memory_space<vmem>>, vector<200x128xf32>
    %cst = arith.constant dense<0.000000e+00> : vector<128xf32>
    %1 = vector.multi_reduction <add>, %0, %cst [0] : vector<200x128xf32> to vector<128xf32>
    %2 = vector.shape_cast %1 : vector<128xf32> to vector<1x128xf32>
    %cst_1 = arith.constant 5.000000e-03 : f32
    %3 = vector.broadcast %cst_1 : f32 to vector<1x128xf32>
    %4 = arith.mulf %2, %3 : vector<1x128xf32>
    %5 = vector.broadcast %4 : vector<1x128xf32> to vector<200x128xf32>
    %6 = arith.subf %0, %5 : vector<200x128xf32>
    %7 = arith.mulf %6, %6 : vector<200x128xf32>
    %cst_2 = arith.constant dense<0.000000e+00> : vector<128xf32>
    %8 = vector.multi_reduction <add>, %7, %cst_2 [0] : vector<200x128xf32> to vector<128xf32>
    %9 = vector.shape_cast %8 : vector<128xf32> to vector<1x128xf32>
    %cst_3 = arith.constant 5.000000e-03 : f32
    %10 = vector.broadcast %cst_3 : f32 to vector<1x128xf32>
    %11 = arith.mulf %9, %10 : vector<1x128xf32>
    %c0_4 = arith.constant 0 : index
    %c0_5 = arith.constant 0 : index
    %12 = vector.load %arg2[%c0_4, %c0_5] : memref<1x128xf32, #tpu.memory_space<vmem>>, vector<1x128xf32>
    %cst_6 = arith.constant 9.99999974E-6 : f32
    %13 = vector.broadcast %cst_6 : f32 to vector<1x128xf32>
    %14 = arith.addf %11, %13 : vector<1x128xf32>
    %15 = math.rsqrt %14 : vector<1x128xf32>
    %16 = arith.mulf %12, %15 : vector<1x128xf32>
    %17 = vector.broadcast %16 : vector<1x128xf32> to vector<200x128xf32>
    %18 = arith.mulf %6, %17 : vector<200x128xf32>
    %c0_7 = arith.constant 0 : index
    %c0_8 = arith.constant 0 : index
    %19 = vector.load %arg3[%c0_7, %c0_8] : memref<1x128xf32, #tpu.memory_space<vmem>>, vector<1x128xf32>
    %20 = vector.broadcast %19 : vector<1x128xf32> to vector<200x128xf32>
    %21 = arith.addf %18, %20 : vector<200x128xf32>
    %c0_9 = arith.constant 0 : index
    %c0_10 = arith.constant 0 : index
    %22 = vector.load %arg4[%c0_9, %c0_10] : memref<200x128xf32, #tpu.memory_space<vmem>>, vector<200x128xf32>
    tpu.vector_store %arg4[%c0_9, %c0_10], %21 {strides = array<i32>} : memref<200x128xf32, #tpu.memory_space<vmem>>, vector<200x128xf32>,
    %c0_11 = arith.constant 0 : index
    %c0_12 = arith.constant 0 : index
    %23 = vector.load %arg5[%c0_11, %c0_12] : memref<1x128xf32, #tpu.memory_space<vmem>>, vector<1x128xf32>
    tpu.vector_store %arg5[%c0_11, %c0_12], %4 {strides = array<i32>} : memref<1x128xf32, #tpu.memory_space<vmem>>, vector<1x128xf32>,
    %c0_13 = arith.constant 0 : index
    %c0_14 = arith.constant 0 : index
    %24 = vector.load %arg6[%c0_13, %c0_14] : memref<1x128xf32, #tpu.memory_space<vmem>>, vector<1x128xf32>
    tpu.vector_store %arg6[%c0_13, %c0_14], %11 {strides = array<i32>} : memref<1x128xf32, #tpu.memory_space<vmem>>, vector<1x128xf32>,
    return
  }
  func.func @transform_0(%arg0: i32) -> (i32, i32) {
    %c0_i32 = arith.constant 0 : i32
    %c0_i32_0 = arith.constant 0 : i32
    return %c0_i32, %arg0 : i32, i32
  }
  func.func @transform_1(%arg0: i32) -> (i32, i32) {
    %c0_i32 = arith.constant 0 : i32
    %c0_i32_0 = arith.constant 0 : i32
    return %c0_i32, %arg0 : i32, i32
  }
  func.func @transform_2(%arg0: i32) -> (i32, i32) {
    %c0_i32 = arith.constant 0 : i32
    %c0_i32_0 = arith.constant 0 : i32
    return %c0_i32, %arg0 : i32, i32
  }
  func.func @transform_3(%arg0: i32) -> (i32, i32) {
    %c0_i32 = arith.constant 0 : i32
    %c0_i32_0 = arith.constant 0 : i32
    return %c0_i32, %arg0 : i32, i32
  }
  func.func @transform_4(%arg0: i32) -> (i32, i32) {
    %c0_i32 = arith.constant 0 : i32
    %c0_i32_0 = arith.constant 0 : i32
    return %c0_i32, %arg0 : i32, i32
  }
  func.func @transform_5(%arg0: i32) -> (i32, i32) {
    %c0_i32 = arith.constant 0 : i32
    %c0_i32_0 = arith.constant 0 : i32
    return %c0_i32, %arg0 : i32, i32
  }
}

</mosaic_0001>

<bundles_post_ra>
// kernel: tpu_custom_call.1
= control target key start
LH: loop header
LB: loop body
LE: loop exit
PB: predicated region body
PF: predicated region fallthrough
CT: control target
= control target key end

     0   :  { %s1667_s0 = inlined_call_operand.hbm [shape: f32[200,256], index: 0, kind: input, shape index: {}]   ;;  %s1668_s1 = inlined_call_operand.hbm [shape: f32[1,256], index: 1, kind: input, shape index: {}]   ;;  %s1669_s2 = inlined_call_operand.vmem [shape: f32[1,256], index: 2, kind: input, shape index: {}]   ;;  %s1670_s3 = inlined_call_operand.hbm [shape: f32[200,256], index: 3, kind: output, shape index: {0}]   ;;  %s1671_s4 = inlined_call_operand.hbm [shape: f32[1,256], index: 4, kind: output, shape index: {1}]   ;;  %s1672_s5 = inlined_call_operand.hbm [shape: f32[1,256], index: 5, kind: output, shape index: {2}]  }
   0x1   :  { %1676 = sst [smem:[#allocation15_spill]] %s1667_s0 }
   0x2   :  { %11 = vsyncpa [#allocation3], 0 }
   0x3   :  { %13 = vsyncpa [#allocation3 + $0x1], 0 }
   0x4   :  { %14 = vsyncpa [#allocation6], 0 }
   0x5   :  { %16 = vsyncpa [#allocation6 + $0x1], 0 }
   0x6   :  { %17 = vsyncpa [#allocation4], 0 }
   0x7   :  { %19 = vsyncpa [#allocation4 + $0x1], 0 }
   0x8   :  { %20 = vsyncpa [#allocation9], 0 }
   0x9   :  { %22 = vsyncpa [#allocation9 + $0x1], 0  ;;  %s1045_s18 = smov 0   ;;  %s1047_s19 = smov 0  }
   0xa   :  { %s1049_s20 = smov 0   ;;  %s1051_s21 = smov 0  }
   0xb LB: > { %s1066_s22 = sadd.s32 4294967295, %s1002_s21   ;;  %s1674_s23 = sadd.s32 4294967294, %s1002_s21   ;;  %s1002_s21 = sphi %s1051_s21, %s1693_s21   ;;  %s998_s20 = sphi %s1049_s20, %s1692_s20   ;;  %s994_s19 = sphi %s1047_s19, %s1691_s19   ;;  %s990_s18 = sphi %s1045_s18, %s1690_s18  }
   0xc   : > { %s1070_s24 = sadd.s32 1, %s1002_s21   ;;  %s35_s25 = sadd.s32 1, %s998_s20 }
   0xd   : > { %s32_s26 = ssub.s32 %s1002_s21, %s1070_s24  ;;  %p42_p0 = scmp.ne.s32.totalorder %s998_s20, %s994_s19 }
   0xe   : > { %p33_p1 = scmp.eq.s32.totalorder %s32_s26, 0  ;;  %p43_p2 = scmp.eq.s32.totalorder %s1002_s21, 0 }
   0xf   : > { %p48_p3 = scmp.ne.s32.totalorder %s994_s19, %s990_s18  ;;  %p49_p4 = scmp.eq.s32.totalorder %s1066_s22, 0 }
  0x10   : > { %s1082_s27 = scalar_select %p33_p1, %s998_s20, %s35_s25  }
  0x11   : > { %p44_p5 = por %p43_p2, %p42_p0  ;;  %p1084_p6 = por %p49_p4, %p48_p3 }
  0x12   : > { %p124_p7 = scmp.eq.s32.totalorder %s1066_s22, 1  ;;  %p130_p8 = scmp.eq.s32.totalorder %s1674_s23, 1 }
  0x13   : > { %s1677_s28 = scalar_select %p1084_p6, 1, 0 }
  0x14   : > { %p780_p10 = scmp.lt.s32.totalorder %s1002_s21, 2  ;;  %p1093_p11 = por %p124_p7, %p42_p0 }
  0x15   : > { %p1097_p12 = por %p130_p8, %p48_p3  ;;  %s1102_s6 = sand.u32 1, %s998_s20  }
  0x16   : > { %s1678_s29 = scalar_select %p1093_p11, 1, 0 }
  0x17   : > { %s1679_s30 = scalar_select %p1097_p12, 1, 0 }
  0x18   : > { %s742_s7 = sshll.u32 %s1002_s21, 7  ;;  %s751_s8 = smul.u32 200, %s1102_s6 }
  0x19   : > { %s1680_s0 = sld [smem:[#allocation15_spill]]  ;;  %p1111_p13 = pnand %p780_p10, %p44_p5 }
  0x1a   : > { %s206_s13 = scalar_lea.vmem [#allocation2], %s751_s8  ;;  %s203_s15 = scalar_lea.sflag [#allocation3], %s1102_s6 }
  0x1b   : > { %s212_s14 = sshll.u32 %s206_s13, 4  ;;  %p824_p2 = pneg %p1111_p13  ;;  %s1115_s14 = int_to_ptr.vmem [resolvable:$true] %s212_s14 }
  0x1f   : > { %s1109_s11 = scalar_lea.hbm %s1680_s0, %s742_s7  ;;  %s827_s26 = scalar_lea.hbm %s1680_s0, 6400 }
  0x20   : > { %s822_s16 = scalar_lea.hbm %s1109_s11, 3200  ;;  %p828_p5 = scmp.lt.s32.totalorder %s1109_s11, %s1680_s0 }
  0x21   : > { %p823_p1 = scmp.ne.s32.totalorder %s1109_s11, %s822_s16  ;;  %p829_p7 = scmp.lt.s32.totalorder %s827_s26, %s822_s16 }
  0x23   : > { %p825_p3 = pnand %p824_p2, %p823_p1  ;;  %p830_p8 = por %p829_p7, %p828_p5 }
  0x25   : > { %p826_p4 = pneg %p825_p3 }
  0x27   : > { %p831_p10 = pnand %p830_p8, %p826_p4 }
  0x29   : > { %834 = shalt.err (!%p831_p10)
}
  0x2a   : > { %s835_s8 = scalar_lea.vmem %s1115_s14, 3200  ;;  %s1004_s10 = smov [#allocation2]  }
  0x2b   : > { %p836_p9 = scmp.ne.s32.totalorder %s1115_s14, %s835_s8  ;;  %s840_s13 = sshll.u32 %s1004_s10, 4  ;;  %s841_s13 = int_to_ptr.vmem [resolvable:$false] %s840_s13 }
  0x2c   : > { %s842_s17 = scalar_lea.vmem %s841_s13, 6400  ;;  %p843_p0 = scmp.lt.s32.totalorder %s1115_s14, %s841_s13 }
  0x2d   : > { %p838_p1 = pnand %p836_p9, %p824_p2  ;;  %p844_p12 = scmp.lt.s32.totalorder %s842_s17, %s835_s8 }
  0x2f   : > { %p839_p3 = pneg %p838_p1  ;;  %p845_p11 = por %p844_p12, %p843_p0 }
  0x31   : > { %p846_p5 = pnand %p845_p11, %p839_p3 }
  0x33   : > { %849 = shalt.err (!%p846_p5)
}
  0x34   : > { %s1005_s16 = smov 256   ;;  %s1006_s25 = smov 128  }
  0x35   : > { %s1007_s26 = smov 8   ;;  %p243_p9 = scmp.lt.s32.totalorder %s1002_s21, 3 }
  0x36   : > { %766 = dma.hbm_to_vmem [thread:$0]  (!%p1111_p13), %s1109_s11, 3200, %s1115_s14, %s203_s15, %s1005_s16, %s1006_s25, %s1007_s26  }
  0x37   : > { %s743_s7 = sshll.u32 %s1002_s21, 4  ;;  %p1682_p11 = scmp.ge.s32.totalorder %s1002_s21, 1 }
  0x38   : > { %s1156_s13 = scalar_lea.hbm %s1668_s1, %s743_s7  ;;  %s225_s17 = scalar_lea.vmem [#allocation5], %s1102_s6 }
  0x39   : > { %p1149_p12 = pnand %p1682_p11, %p243_p9  ;;  %s232_s23 = sshll.u32 %s225_s17, 4  ;;  %s233_s23 = int_to_ptr.vmem [resolvable:$true] %s232_s23 }
  0x3a   : > { %s223_s0 = scalar_lea.sflag [#allocation6], %s1102_s6  ;;  %s850_s11 = scalar_lea.hbm %s1156_s13, 16 }
  0x3b   : > { %s1683_s9 = scalar_select %p1149_p12, 1, 0 }
  0x3c   : > { %p851_p0 = scmp.ne.s32.totalorder %s1156_s13, %s850_s11  ;;  %s855_s16 = scalar_lea.hbm %s1668_s1, 32 }
  0x3d   : > { %p856_p8 = scmp.lt.s32.totalorder %s1156_s13, %s1668_s1  ;;  %p857_p10 = scmp.lt.s32.totalorder %s855_s16, %s850_s11 }
  0x3e   : > { %p853_p4 = pnand %p851_p0, %p824_p2 }
  0x3f   : > { %p858_p1 = por %p857_p10, %p856_p8 }
  0x40   : > { %p854_p7 = pneg %p853_p4 }
  0x42   : > { %p859_p3 = pnand %p858_p1, %p854_p7 }
  0x44   : > { %862 = shalt.err (!%p859_p3)
}
  0x45   : > { %s863_s7 = scalar_lea.vmem %s233_s23, 16  ;;  %s1008_s6 = smov [#allocation5]  }
  0x46   : > { %p864_p5 = scmp.ne.s32.totalorder %s233_s23, %s863_s7  ;;  %s868_s8 = sshll.u32 %s1008_s6, 4  ;;  %s869_s8 = int_to_ptr.vmem [resolvable:$false] %s868_s8 }
  0x47   : > { %s870_s10 = scalar_lea.vmem %s869_s8, 32  ;;  %p871_p0 = scmp.lt.s32.totalorder %s233_s23, %s869_s8 }
  0x48   : > { %p866_p9 = pnand %p864_p5, %p824_p2  ;;  %p872_p4 = scmp.lt.s32.totalorder %s870_s10, %s863_s7 }
  0x4a   : > { %p867_p11 = pneg %p866_p9  ;;  %p873_p6 = por %p872_p4, %p871_p0 }
  0x4c   : > { %p874_p12 = pnand %p873_p6, %p867_p11 }
  0x4e   : > { %877 = shalt.err (!%p874_p12)
}
  0x4f   : > { %769 = dma.hbm_to_vmem [thread:$0]  (!%p1111_p13), %s1156_s13, 16, %s233_s23, %s223_s0  }
  0x50   : > { %p1684_p7 = scmp.ne.s32.totalorder %s1683_s9, 0 }
  0x51   : > { %s1181_s17 = sand.u32 (!%p1684_p7), 1, %s994_s19   ;;  %p1685_p6 = scmp.ne.s32.totalorder (!%p1684_p7), %s1677_s28, 0 }
  0x52   : > { %247 = sbr.rel (%p1684_p7) target bundleno = 293 (0x125), region = 32  ;;  %s250_s14 = scalar_lea.sflag (!%p1684_p7), [#allocation3], %s1181_s17 }
  0x53   : > { %s752_s11 = smul.u32 (!%p1684_p7), 200, %s1181_s17 }
  0x55   : > { %s1187_s15 = scalar_lea.vmem (!%p1684_p7), [#allocation2], %s752_s11 }
  0x57   : > { %973 = dma.done.wait (%p1685_p6), %s250_s14, 3200  }
  0x58   : > { %975 = vsyncadd (%p1685_p6), %s250_s14, 4294964096  ;;  %s259_s0 = scalar_lea.sflag [#allocation6], %s1181_s17  ;;  %s261_s23 = scalar_lea.vmem [#allocation5], %s1181_s17 }
  0x59   : > { %977 = dma.done.wait (%p1685_p6), %s259_s0, 16  }
  0x5a   : > { %979 = vsyncadd (%p1685_p6), %s259_s0, 4294967280  ;;  %v1200_v0 = vld [vmem:[%s1187_s15] sm:$0xff]  ;;  %v1203_v1 = vld [vmem:[%s1187_s15 + $0x8] sm:$0xff]  ;;  %s296_s28 = scalar_lea.vmem [#allocation8], %s1181_s17  ;;  %s542_s9 = sand.u32 1, %s1066_s22  }
  0x5b   : > { %v1206_v2 = vld [vmem:[%s1187_s15 + $0x10] sm:$0xff]  ;;  %v331_v3 = vadd.f32 %v1203_v1, %v1200_v0  ;;  %v1211_v4 = vld [vmem:[%s1187_s15 + $0x18] sm:$0xff]  ;;  %v1215_v6 = vld [vmem:[%s1187_s15 + $0x20] sm:$0xff]  ;;  %s574_s12 = sshll.u32 %s296_s28, 4  ;;  %s747_s13 = sshll.u32 %s1066_s22, 4  ;;  %s1302_s12 = int_to_ptr.vmem [resolvable:$true] %s574_s12 }
  0x5c   : > { %v1219_v8 = vld [vmem:[%s1187_s15 + $0x28] sm:$0xff]  ;;  %v1223_v10 = vld [vmem:[%s1187_s15 + $0x30] sm:$0xff]  ;;  %v1227_v12 = vld [vmem:[%s1187_s15 + $0x38] sm:$0xff]  ;;  %s572_s26 = scalar_lea.hbm %s1671_s4, %s747_s13  ;;  %s1312_s7 = scalar_lea.sflag [#allocation9], %s542_s9 }
  0x5d   : > { %v332_v5 = vadd.f32 %v331_v3, %v1206_v2  ;;  %v1231_v14 = vld [vmem:[%s1187_s15 + $0x40] sm:$0xff]  ;;  %v1235_v16 = vld [vmem:[%s1187_s15 + $0x48] sm:$0xff]  ;;  %v1239_v18 = vld [vmem:[%s1187_s15 + $0x50] sm:$0xff]  ;;  %s878_s6 = scalar_lea.vmem %s1302_s12, 16  ;;  %p1686_p2 = scmp.ne.s32.totalorder %s1678_s29, 0 }
  0x5e   : > { %v1243_v20 = vld [vmem:[%s1187_s15 + $0x58] sm:$0xff]  ;;  %v1247_v22 = vld [vmem:[%s1187_s15 + $0x60] sm:$0xff]  ;;  %v1251_v24 = vld [vmem:[%s1187_s15 + $0x68] sm:$0xff]  ;;  %p879_p13 = scmp.ne.s32.totalorder %s1302_s12, %s878_s6  ;;  %s1009_s8 = smov [#allocation8]  }
  0x5f   : > { %v333_v7 = vadd.f32 %v332_v5, %v1211_v4  ;;  %v1255_v26 = vld [vmem:[%s1187_s15 + $0x70] sm:$0xff]  ;;  %v1259_v28 = vld [vmem:[%s1187_s15 + $0x78] sm:$0xff]  ;;  %v1263_v30 = vld [vmem:[%s1187_s15 + $0x80] sm:$0xff]  ;;  %s882_s10 = sshll.u32 %s1009_s8, 4  ;;  %s883_s10 = int_to_ptr.vmem [resolvable:$false] %s882_s10 }
  0x60   : > { %v1267_v32 = vld [vmem:[%s1187_s15 + $0x88] sm:$0xff]  ;;  %v1271_v34 = vld [vmem:[%s1187_s15 + $0x90] sm:$0xff]  ;;  %v1275_v36 = vld [vmem:[%s1187_s15 + $0x98] sm:$0xff]  ;;  %p880_p12 = pnand %p879_p13, %p1686_p2  ;;  %s884_s14 = scalar_lea.vmem %s883_s10, 32 }
  0x61   : > { %v334_v9 = vadd.f32 %v333_v7, %v1215_v6  ;;  %v1279_v38 = vld [vmem:[%s1187_s15 + $0xa0] sm:$0xff]  ;;  %v1283_v40 = vld [vmem:[%s1187_s15 + $0xa8] sm:$0xff]  ;;  %v1287_v42 = vld [vmem:[%s1187_s15 + $0xb0] sm:$0xff]  ;;  %p885_p10 = scmp.lt.s32.totalorder %s1302_s12, %s883_s10  ;;  %p886_p1 = scmp.lt.s32.totalorder %s884_s14, %s878_s6 }
  0x62   : > { %v1291_v44 = vld [vmem:[%s1187_s15 + $0xb8] sm:$0xff]  ;;  %v1295_v46 = vld [vmem:[%s1187_s15 + $0xc0] sm:$0xff]  ;;  %p881_p8 = pneg %p880_p12 }
  0x63   : > { %v335_v11 = vadd.f32 %v334_v9, %v1219_v8  ;;  %p887_p3 = por %p886_p1, %p885_p10 }
  0x65   : > { %v336_v13 = vadd.f32 %v335_v11, %v1223_v10  ;;  %p888_p5 = pnand %p887_p3, %p881_p8 }
  0x67   : > { %v337_v15 = vadd.f32 %v336_v13, %v1227_v12 }
  0x69   : > { %v338_v17 = vadd.f32 %v337_v15, %v1231_v14 }
  0x6b   : > { %v339_v19 = vadd.f32 %v338_v17, %v1235_v16 }
  0x6d   : > { %v340_v21 = vadd.f32 %v339_v19, %v1239_v18 }
  0x6f   : > { %v341_v23 = vadd.f32 %v340_v21, %v1243_v20 }
  0x71   : > { %v342_v25 = vadd.f32 %v341_v23, %v1247_v22 }
  0x73   : > { %v343_v27 = vadd.f32 %v342_v25, %v1251_v24 }
  0x75   : > { %v344_v29 = vadd.f32 %v343_v27, %v1255_v26 }
  0x77   : > { %v345_v31 = vadd.f32 %v344_v29, %v1259_v28 }
  0x79   : > { %v346_v33 = vadd.f32 %v345_v31, %v1263_v30 }
  0x7b   : > { %v347_v35 = vadd.f32 %v346_v33, %v1267_v32 }
  0x7d   : > { %v348_v37 = vadd.f32 %v347_v35, %v1271_v34 }
  0x7f   : > { %v349_v39 = vadd.f32 %v348_v37, %v1275_v36 }
  0x81   : > { %v350_v41 = vadd.f32 %v349_v39, %v1279_v38 }
  0x83   : > { %v351_v43 = vadd.f32 %v350_v41, %v1283_v40 }
  0x85   : > { %v352_v45 = vadd.f32 %v351_v43, %v1287_v42 }
  0x87   : > { %v353_v47 = vadd.f32 %v352_v45, %v1291_v44 }
  0x89   : > { %v354_v48 = vadd.f32 %v353_v47, %v1295_v46 }
  0x8b   : > { %v355_v49 = vrot.slane %v354_v48, 4 }
  0x8d   : > { %v356_v50 = vadd.f32 %v355_v49, %v354_v48 }
  0x8f   : > { %v357_v51 = vrot.slane %v356_v50, 2 }
  0x91   : > { %v358_v52 = vadd.f32 %v357_v51, %v356_v50 }
  0x93   : > { %v359_v53 = vrot.slane %v358_v52, 1 }
  0x95   : > { %v360_v54 = vadd.f32 %v359_v53, %v358_v52 }
  0x97   : > { %v1304_v55 = vmul.f32 0.005, %v360_v54 }
  0x99   : > { %535 = vst [vmem:[%s296_s28] sm:$0x1] %v1304_v55 }
  0x9a   : > { %891 = shalt.err (!%p888_p5)
}
  0x9b   : > { %s892_s15 = scalar_lea.hbm %s572_s26, 16  ;;  %s896_s9 = scalar_lea.hbm %s1671_s4, 32 }
  0x9c   : > { %p893_p9 = scmp.ne.s32.totalorder %s572_s26, %s892_s15  ;;  %p897_p4 = scmp.lt.s32.totalorder %s572_s26, %s1671_s4 }
  0x9d   : > { %p898_p7 = scmp.lt.s32.totalorder %s896_s9, %s892_s15 }
  0x9e   : > { %p894_p11 = pnand %p893_p9, %p1686_p2 }
  0x9f   : > { %p899_p6 = por %p898_p7, %p897_p4 }
  0xa0   : > { %p895_p0 = pneg %p894_p11 }
  0xa2   : > { %p900_p13 = pnand %p899_p6, %p895_p0 }
  0xa4   : > { %903 = shalt.err (!%p900_p13)
}
  0xa5   : > { %758 = dma.vmem_to_hbm [thread:$0]  (%p1686_p2), %s1302_s12, 16, %s572_s26, %s1312_s7   ;;  %v1333_v56 = vsub.f32 %v1200_v0, %v1304_v55  ;;  %v1337_v57 = vsub.f32 %v1203_v1, %v1304_v55  ;;  %v1341_v58 = vsub.f32 %v1206_v2, %v1304_v55  ;;  %v1345_v59 = vsub.f32 %v1211_v4, %v1304_v55 }
  0xa6   : > { %v1353_v62 = vsub.f32 %v1215_v6, %v1304_v55  ;;  %v1359_v0 = vsub.f32 %v1219_v8, %v1304_v55  ;;  %v1365_v3 = vsub.f32 %v1223_v10, %v1304_v55  ;;  %v1371_v6 = vsub.f32 %v1227_v12, %v1304_v55  ;;  %s302_s12 = scalar_lea.vmem [#allocation10], %s1181_s17  ;;  %s585_s10 = scalar_lea.hbm %s1672_s5, %s747_s13 }
  0xa7   : > { %v387_v60 = vmul.f32 %v1333_v56, %v1333_v56  ;;  %v388_v61 = vmul.f32 %v1337_v57, %v1337_v57  ;;  %v389_v63 = vmul.f32 %v1341_v58, %v1341_v58  ;;  %v390_v1 = vmul.f32 %v1345_v59, %v1345_v59  ;;  %s587_s26 = sshll.u32 %s302_s12, 4  ;;  %s1010_s15 = smov [#allocation10]   ;;  %s588_s26 = int_to_ptr.vmem [resolvable:$true] %s587_s26 }
  0xa8   : > { %v391_v4 = vmul.f32 %v1353_v62, %v1353_v62  ;;  %v392_v7 = vmul.f32 %v1359_v0, %v1359_v0  ;;  %v1377_v9 = vsub.f32 %v1231_v14, %v1304_v55  ;;  %v393_v10 = vmul.f32 %v1365_v3, %v1365_v3  ;;  %s904_s14 = scalar_lea.vmem %s588_s26, 16  ;;  %s908_s0 = sshll.u32 %s1010_s15, 4  ;;  %s909_s0 = int_to_ptr.vmem [resolvable:$false] %s908_s0 }
  0xa9   : > { %v412_v2 = vadd.f32 %v388_v61, %v387_v60  ;;  %v1383_v13 = vsub.f32 %v1235_v16, %v1304_v55  ;;  %v394_v12 = vmul.f32 %v1371_v6, %v1371_v6  ;;  %v1389_v17 = vsub.f32 %v1239_v18, %v1304_v55  ;;  %p905_p12 = scmp.ne.s32.totalorder %s588_s26, %s904_s14  ;;  %s910_s28 = scalar_lea.vmem %s909_s0, 32 }
  0xaa   : > { %v395_v14 = vmul.f32 %v1377_v9, %v1377_v9  ;;  %v1395_v21 = vsub.f32 %v1243_v20, %v1304_v55  ;;  %v1401_v25 = vsub.f32 %v1247_v22, %v1304_v55  ;;  %v1407_v29 = vsub.f32 %v1251_v24, %v1304_v55  ;;  %p911_p1 = scmp.lt.s32.totalorder %s588_s26, %s909_s0  ;;  %p912_p3 = scmp.lt.s32.totalorder %s910_s28, %s904_s14 }
  0xab   : > { %v413_v5 = vadd.f32 %v412_v2, %v389_v63  ;;  %v396_v16 = vmul.f32 %v1383_v13, %v1383_v13  ;;  %v397_v18 = vmul.f32 %v1389_v17, %v1389_v17  ;;  %v1413_v33 = vsub.f32 %v1255_v26, %v1304_v55  ;;  %p906_p8 = pnand %p905_p12, %p1686_p2 }
  0xac   : > { %v398_v20 = vmul.f32 %v1395_v21, %v1395_v21  ;;  %v399_v22 = vmul.f32 %v1401_v25, %v1401_v25  ;;  %v1419_v37 = vsub.f32 %v1259_v28, %v1304_v55  ;;  %v400_v24 = vmul.f32 %v1407_v29, %v1407_v29  ;;  %p913_p5 = por %p912_p3, %p911_p1 }
  0xad   : > { %v414_v8 = vadd.f32 %v413_v5, %v390_v1  ;;  %v1425_v41 = vsub.f32 %v1263_v30, %v1304_v55  ;;  %v401_v26 = vmul.f32 %v1413_v33, %v1413_v33  ;;  %v1431_v45 = vsub.f32 %v1267_v32, %v1304_v55  ;;  %p907_p10 = pneg %p906_p8 }
  0xae   : > { %v402_v28 = vmul.f32 %v1419_v37, %v1419_v37  ;;  %v1437_v48 = vsub.f32 %v1271_v34, %v1304_v55  ;;  %v1443_v50 = vsub.f32 %v1275_v36, %v1304_v55  ;;  %v1449_v52 = vsub.f32 %v1279_v38, %v1304_v55 }
  0xaf   : > { %v415_v11 = vadd.f32 %v414_v8, %v391_v4  ;;  %v403_v30 = vmul.f32 %v1425_v41, %v1425_v41  ;;  %v404_v32 = vmul.f32 %v1431_v45, %v1431_v45  ;;  %v1455_v54 = vsub.f32 %v1283_v40, %v1304_v55  ;;  %p914_p9 = pnand %p913_p5, %p907_p10 }
  0xb0   : > { %v405_v34 = vmul.f32 %v1437_v48, %v1437_v48  ;;  %v406_v36 = vmul.f32 %v1443_v50, %v1443_v50  ;;  %v1461_v61 = vsub.f32 %v1287_v42, %v1304_v55  ;;  %v407_v38 = vmul.f32 %v1449_v52, %v1449_v52 }
  0xb1   : > { %v416_v15 = vadd.f32 %v415_v11, %v392_v7  ;;  %v1467_v1 = vsub.f32 %v1291_v44, %v1304_v55  ;;  %v408_v40 = vmul.f32 %v1455_v54, %v1455_v54  ;;  %v1473_v4 = vsub.f32 %v1295_v46, %v1304_v55 }
  0xb2   : > { %v409_v42 = vmul.f32 %v1461_v61, %v1461_v61 }
  0xb3   : > { %v417_v19 = vadd.f32 %v416_v15, %v393_v10  ;;  %v410_v7 = vmul.f32 %v1467_v1, %v1467_v1  ;;  %v411_v44 = vmul.f32 %v1473_v4, %v1473_v4 }
  0xb5   : > { %v418_v23 = vadd.f32 %v417_v19, %v394_v12 }
  0xb7   : > { %v419_v27 = vadd.f32 %v418_v23, %v395_v14 }
  0xb9   : > { %v420_v31 = vadd.f32 %v419_v27, %v396_v16 }
  0xbb   : > { %v421_v35 = vadd.f32 %v420_v31, %v397_v18 }
  0xbd   : > { %v422_v39 = vadd.f32 %v421_v35, %v398_v20 }
  0xbf   : > { %v423_v43 = vadd.f32 %v422_v39, %v399_v22 }
  0xc1   : > { %v424_v47 = vadd.f32 %v423_v43, %v400_v24 }
  0xc3   : > { %v425_v49 = vadd.f32 %v424_v47, %v401_v26 }
  0xc5   : > { %v426_v51 = vadd.f32 %v425_v49, %v402_v28 }
  0xc7   : > { %v427_v53 = vadd.f32 %v426_v51, %v403_v30 }
  0xc9   : > { %v428_v60 = vadd.f32 %v427_v53, %v404_v32 }
  0xcb   : > { %v429_v63 = vadd.f32 %v428_v60, %v405_v34 }
  0xcd   : > { %v430_v2 = vadd.f32 %v429_v63, %v406_v36 }
  0xcf   : > { %v431_v5 = vadd.f32 %v430_v2, %v407_v38 }
  0xd1   : > { %v432_v8 = vadd.f32 %v431_v5, %v408_v40 }
  0xd3   : > { %v433_v10 = vadd.f32 %v432_v8, %v409_v42 }
  0xd5   : > { %v434_v11 = vadd.f32 %v433_v10, %v410_v7 }
  0xd7   : > { %v435_v12 = vadd.f32 %v434_v11, %v411_v44 }
  0xd9   : > { %v436_v15 = vrot.slane %v435_v12, 4 }
  0xdb   : > { %v437_v14 = vadd.f32 %v436_v15, %v435_v12 }
  0xdd   : > { %v438_v46 = vrot.slane %v437_v14, 2 }
  0xdf   : > { %v439_v55 = vadd.f32 %v438_v46, %v437_v14 }
  0xe1   : > { %v440_v19 = vrot.slane %v439_v55, 1 }
  0xe3   : > { %v441_v16 = vadd.f32 %v440_v19, %v439_v55 }
  0xe5   : > { %v442_v23 = vmul.f32 0.005, %v441_v16 }
  0xe7   : > { %v444_v18 = vadd.f32 1e-05, %v442_v23  ;;  %536 = vst [vmem:[%s302_s12] sm:$0x1] %v442_v23 }
  0xe8   : > { %917 = shalt.err (!%p914_p9)
}
  0xe9   : > { %s918_s9 = scalar_lea.hbm %s585_s10, 16  ;;  %s922_s25 = scalar_lea.hbm %s1672_s5, 32 }
  0xea   : > { %p919_p11 = scmp.ne.s32.totalorder %s585_s10, %s918_s9  ;;  %p923_p7 = scmp.lt.s32.totalorder %s585_s10, %s1672_s5 }
  0xeb   : > { %p924_p6 = scmp.lt.s32.totalorder %s922_s25, %s918_s9 }
  0xec   : > { %p920_p0 = pnand %p919_p11, %p1686_p2 }
  0xed   : > { %p925_p13 = por %p924_p6, %p923_p7 }
  0xee   : > { %p921_p4 = pneg %p920_p0 }
  0xf0   : > { %p926_p12 = pnand %p925_p13, %p921_p4 }
  0xf2   : > { %929 = shalt.err (!%p926_p12)
}
  0xf3   : > { %759 = dma.vmem_to_hbm [thread:$0]  (%p1686_p2), %s588_s26, 16, %s585_s10, %s1312_s7   ;;  %820 = vrsqrt.f32 %v444_v18  ;;  %v448_v27 = vlaneseq  ;;  %v443_v31 = vld [vmem:[%s261_s23] sm:$0x1] }
  0xf4   : > { %p303_p8 = scmp.lt.s32.totalorder %s1066_s22, 1  ;;  %s1537_s23 = scalar_lea.vmem [#allocation7], %s752_s11 }
  0xf5   : > { %v449_v20 = vshrl.u32 %v448_v27, 7  ;;  %s746_s11 = sshll.u32 %s1066_s22, 7  ;;  %s558_s7 = sshll.u32 %s1537_s23, 4  ;;  %s1620_s7 = int_to_ptr.vmem [resolvable:$true] %s558_s7 }
  0xf6   : > { %s304_s8 = scalar_select %p303_p8, %s1066_s22, 1 }
  0xf7   : > { %v450_v22 = vsub.s32 0, %v449_v20  ;;  %s1614_s10 = scalar_lea.hbm %s1670_s3, %s746_s11  ;;  %s538_s28 = scalar_lea.sflag [#allocation4], %s1181_s17 }
  0xf8   : > { %s305_s0 = scalar_lea.vmem %s1669_s2, %s304_s8  ;;  %s930_s9 = scalar_lea.vmem %s1620_s7, 3200 }
  0xf9   : > { %v1509_v26 = vld [vmem:[%s305_s0] ss:$0 sm:$0xff]  ;;  %p931_p10 = scmp.ne.s32.totalorder %s1620_s7, %s930_s9  ;;  %s1011_s13 = smov [#allocation7]  }
  0xfa   : > { %s934_s16 = sshll.u32 %s1011_s13, 4  ;;  %s935_s16 = int_to_ptr.vmem [resolvable:$false] %s934_s16 }
  0xfb   : > { %p932_p1 = pnand %p931_p10, %p1686_p2  ;;  %s936_s25 = scalar_lea.vmem %s935_s16, 6400 }
  0xfc   : > { %p937_p5 = scmp.lt.s32.totalorder %s1620_s7, %s935_s16  ;;  %p938_p9 = scmp.lt.s32.totalorder %s936_s25, %s930_s9 }
  0xfd   : > { %p933_p3 = pneg %p932_p1 }
  0xfe   : > { %p939_p11 = por %p938_p9, %p937_p5 }
 0x100   : > { %v821_v35 = vpop.eup %820  ;;  %p940_p0 = pnand %p939_p11, %p933_p3 }
 0x101   : > { %v446_v24 = vmul.f32 %v821_v35, %v443_v31 }
 0x103   : > { %v1507_v39 = vrot.slane %v446_v24, %v450_v22 }
 0x105   : > { %v453_v43 = vmul.f32 %v1507_v39, %v1333_v56  ;;  %v454_v28 = vmul.f32 %v1507_v39, %v1337_v57  ;;  %v455_v47 = vmul.f32 %v1507_v39, %v1341_v58  ;;  %v456_v30 = vmul.f32 %v1507_v39, %v1345_v59 }
 0x106   : > { %v457_v49 = vmul.f32 %v1507_v39, %v1353_v62  ;;  %v458_v32 = vmul.f32 %v1507_v39, %v1359_v0  ;;  %v459_v51 = vmul.f32 %v1507_v39, %v1365_v3  ;;  %v460_v56 = vmul.f32 %v1507_v39, %v1371_v6 }
 0x107   : > { %v485_v57 = vadd.f32 %v1509_v26, %v453_v43  ;;  %v486_v34 = vadd.f32 %v1509_v26, %v454_v28  ;;  %v487_v58 = vadd.f32 %v1509_v26, %v455_v47  ;;  %v488_v59 = vadd.f32 %v1509_v26, %v456_v30 }
 0x108   : > { %v489_v53 = vadd.f32 %v1509_v26, %v457_v49  ;;  %v490_v62 = vadd.f32 %v1509_v26, %v458_v32  ;;  %v491_v0 = vadd.f32 %v1509_v26, %v459_v51  ;;  %v492_v36 = vadd.f32 %v1509_v26, %v460_v56 }
 0x109   : > { %510 = vst [vmem:[%s1537_s23] sm:$0xff] %v485_v57  ;;  %511 = vst [vmem:[%s1537_s23 + $0x8] sm:$0xff] %v486_v34  ;;  %v461_v3 = vmul.f32 %v1507_v39, %v1377_v9  ;;  %v462_v6 = vmul.f32 %v1507_v39, %v1383_v13  ;;  %v463_v60 = vmul.f32 %v1507_v39, %v1389_v17 }
 0x10a   : > { %512 = vst [vmem:[%s1537_s23 + $0x10] sm:$0xff] %v487_v58  ;;  %513 = vst [vmem:[%s1537_s23 + $0x18] sm:$0xff] %v488_v59  ;;  %v464_v38 = vmul.f32 %v1507_v39, %v1395_v21  ;;  %v465_v9 = vmul.f32 %v1507_v39, %v1401_v25  ;;  %v466_v13 = vmul.f32 %v1507_v39, %v1407_v29 }
 0x10b   : > { %514 = vst [vmem:[%s1537_s23 + $0x20] sm:$0xff] %v489_v53  ;;  %515 = vst [vmem:[%s1537_s23 + $0x28] sm:$0xff] %v490_v62  ;;  %v467_v17 = vmul.f32 %v1507_v39, %v1413_v33  ;;  %v468_v21 = vmul.f32 %v1507_v39, %v1419_v37  ;;  %v493_v63 = vadd.f32 %v1509_v26, %v461_v3 }
 0x10c   : > { %516 = vst [vmem:[%s1537_s23 + $0x30] sm:$0xff] %v491_v0  ;;  %517 = vst [vmem:[%s1537_s23 + $0x38] sm:$0xff] %v492_v36  ;;  %v494_v40 = vadd.f32 %v1509_v26, %v462_v6  ;;  %v495_v2 = vadd.f32 %v1509_v26, %v463_v60  ;;  %v496_v25 = vadd.f32 %v1509_v26, %v464_v38 }
 0x10d   : > { %v497_v29 = vadd.f32 %v1509_v26, %v465_v9  ;;  %v498_v42 = vadd.f32 %v1509_v26, %v466_v13  ;;  %v499_v33 = vadd.f32 %v1509_v26, %v467_v17  ;;  %v500_v37 = vadd.f32 %v1509_v26, %v468_v21  ;;  %518 = vst [vmem:[%s1537_s23 + $0x40] sm:$0xff] %v493_v63 }
 0x10e   : > { %519 = vst [vmem:[%s1537_s23 + $0x48] sm:$0xff] %v494_v40  ;;  %520 = vst [vmem:[%s1537_s23 + $0x50] sm:$0xff] %v495_v2  ;;  %v469_v5 = vmul.f32 %v1507_v39, %v1425_v41  ;;  %v470_v7 = vmul.f32 %v1507_v39, %v1431_v45  ;;  %v471_v8 = vmul.f32 %v1507_v39, %v1437_v48 }
 0x10f   : > { %521 = vst [vmem:[%s1537_s23 + $0x58] sm:$0xff] %v496_v25  ;;  %v472_v44 = vmul.f32 %v1507_v39, %v1443_v50  ;;  %522 = vst [vmem:[%s1537_s23 + $0x60] sm:$0xff] %v497_v29  ;;  %v473_v10 = vmul.f32 %v1507_v39, %v1449_v52  ;;  %v474_v41 = vmul.f32 %v1507_v39, %v1455_v54 }
 0x110   : > { %523 = vst [vmem:[%s1537_s23 + $0x68] sm:$0xff] %v498_v42  ;;  %524 = vst [vmem:[%s1537_s23 + $0x70] sm:$0xff] %v499_v33  ;;  %v475_v45 = vmul.f32 %v1507_v39, %v1461_v61  ;;  %v476_v48 = vmul.f32 %v1507_v39, %v1467_v1  ;;  %v501_v50 = vadd.f32 %v1509_v26, %v469_v5 }
 0x111   : > { %525 = vst [vmem:[%s1537_s23 + $0x78] sm:$0xff] %v500_v37  ;;  %v502_v11 = vadd.f32 %v1509_v26, %v470_v7  ;;  %v503_v52 = vadd.f32 %v1509_v26, %v471_v8  ;;  %v504_v54 = vadd.f32 %v1509_v26, %v472_v44  ;;  %v505_v12 = vadd.f32 %v1509_v26, %v473_v10 }
 0x112   : > { %v506_v61 = vadd.f32 %v1509_v26, %v474_v41  ;;  %v507_v1 = vadd.f32 %v1509_v26, %v475_v45  ;;  %v508_v15 = vadd.f32 %v1509_v26, %v476_v48  ;;  %526 = vst [vmem:[%s1537_s23 + $0x80] sm:$0xff] %v501_v50  ;;  %v477_v14 = vmul.f32 %v1507_v39, %v1473_v4 }
 0x113   : > { %527 = vst [vmem:[%s1537_s23 + $0x88] sm:$0xff] %v502_v11  ;;  %528 = vst [vmem:[%s1537_s23 + $0x90] sm:$0xff] %v503_v52 }
 0x114   : > { %529 = vst [vmem:[%s1537_s23 + $0x98] sm:$0xff] %v504_v54  ;;  %530 = vst [vmem:[%s1537_s23 + $0xa0] sm:$0xff] %v505_v12  ;;  %v509_v46 = vadd.f32 %v1509_v26, %v477_v14 }
 0x115   : > { %531 = vst [vmem:[%s1537_s23 + $0xa8] sm:$0xff] %v506_v61  ;;  %532 = vst [vmem:[%s1537_s23 + $0xb0] sm:$0xff] %v507_v1 }
 0x116   : > { %533 = vst [vmem:[%s1537_s23 + $0xb8] sm:$0xff] %v508_v15  ;;  %534 = vst [vmem:[%s1537_s23 + $0xc0] sm:$0xff] %v509_v46 }
 0x117   : > { %943 = shalt.err (!%p940_p0)
}
 0x118   : > { %s944_s12 = scalar_lea.hbm %s1614_s10, 3200  ;;  %s948_s14 = scalar_lea.hbm %s1670_s3, 6400 }
 0x119   : > { %p945_p4 = scmp.ne.s32.totalorder %s1614_s10, %s944_s12  ;;  %p949_p13 = scmp.lt.s32.totalorder %s1614_s10, %s1670_s3 }
 0x11a   : > { %p950_p12 = scmp.lt.s32.totalorder %s948_s14, %s944_s12 }
 0x11b   : > { %p946_p7 = pnand %p945_p4, %p1686_p2 }
 0x11c   : > { %p951_p8 = por %p950_p12, %p949_p13 }
 0x11d   : > { %p947_p6 = pneg %p946_p7 }
 0x11f   : > { %p952_p10 = pnand %p951_p8, %p947_p6 }
 0x121   : > { %955 = shalt.err (!%p952_p10)
}
 0x122   : > { %s1012_s23 = smov 128   ;;  %s1013_s11 = smov 256  }
 0x123   : > { %s1014_s22 = smov 8  }
 0x124   : > { %757 = dma.vmem_to_hbm [thread:$0]  (%p1686_p2), %s1620_s7, 3200, %s1614_s10, %s538_s28, %s1012_s23, %s1013_s11, %s1014_s22  }
 0x125 PF: > { %s599_s26 = sand.u32 1, %s990_s18   ;;  %p1687_p1 = scmp.ne.s32.totalorder %s1679_s30, 0 }
 0x126   : > { %p1688_p3 = scmp.ge.s32.totalorder %s1002_s21, 2  ;;  %s600_s9 = scalar_lea.sflag [#allocation4], %s599_s26 }
 0x128   : > { %p771_p5 = pnand %p1688_p3, %p1687_p1 }
 0x12a   : > { %p772_p9 = pneg %p771_p5 }
 0x12c   : > { %981 = dma.done.wait (%p772_p9), %s600_s9, 3200  }
 0x12d   : > { %983 = vsyncadd (%p772_p9), %s600_s9, 4294964096  ;;  %s1689_s13 = sadd.s32 4294967294, %s1002_s21  }
 0x12e   : > { %s608_s16 = sand.u32 1, %s1689_s13  }
 0x12f   : > { %s609_s25 = scalar_lea.sflag [#allocation9], %s608_s16 }
 0x130   : > { %985 = dma.done.wait (%p772_p9), %s609_s25, 32  }
 0x131   : > { %987 = vsyncadd (%p772_p9), %s609_s25, 4294967264  ;;  %p25_p2 = scmp.ge.s32.totalorder %s1070_s24, 4   ;;  %s1690_s18 = smov %s994_s19 }
 0x132   : > { %s1691_s19 = smov %s998_s20  ;;  %s1692_s20 = smov %s1082_s27 }
 0x133   : > { %s1693_s21 = smov %s1070_s24  ;;  %27 = sbr.rel (!%p25_p2) target bundleno = 11 (0xb), region = 125 }
 0x138   :  { %621 = vsyncpa [#allocation3], 1 }
 0x139   :  { %623 = vsyncpa [#allocation3 + $0x1], 1 }
 0x13a   :  { %624 = vsyncpa [#allocation6], 1 }
 0x13b   :  { %626 = vsyncpa [#allocation6 + $0x1], 1 }
 0x13c   :  { %627 = vsyncpa [#allocation4], 1 }
 0x13d   :  { %629 = vsyncpa [#allocation4 + $0x1], 1 }
 0x13e   :  { %630 = vsyncpa [#allocation9], 1 }
 0x13f   :  { %632 = vsyncpa [#allocation9 + $0x1], 1 }

</bundles_post_ra>
